<compile_context>
chip_gen: v7x
topology: tpu7x:2x2x1
jax: 0.10.0
libtpu: 0.0.40
codegen_flags: <defaults>
</compile_context>

<pallas_src>
import jax
import jax.numpy as jnp
from jax.experimental import pallas as pl
from jax.experimental.pallas import tpu as pltpu

_LANES = 128
_SUBLANES = 8
_MAX_BLOCK_ROWS = 1024          # 1024x128 f32 = 512 KiB/buffer; 2 inputs x 2 bufs = 2 MiB


def _metrics_kernel(n_ref, inp_ref, tgt_ref, acc_ref):
    """Accumulate (correct_count, TP, sum_targets) partials into acc_ref (3,8,128)."""
    i = pl.program_id(0)

    @pl.when(i == 0)
    def _():
        acc_ref[...] = jnp.zeros_like(acc_ref)

    x = inp_ref[...].astype(jnp.float32)            # (BR, 128)
    t = tgt_ref[...].astype(jnp.float32)            # (BR, 128)
    br = x.shape[0]
    blk_elems = br * _LANES                         # python int (static)

    # Validity mask for this block: global element index < n_valid.
    # (int32 offsets are fine for < ~2^31 elements.)
    row = jax.lax.broadcasted_iota(jnp.int32, (br, _LANES), 0)
    lane = jax.lax.broadcasted_iota(jnp.int32, (br, _LANES), 1)
    rem = n_ref[0] - i * blk_elems                  # valid elems remaining from block start
    mask = (row * _LANES + lane) < rem

    # Exact float-equality semantics of the reference: pred in {0,1}, so
    # (pred == t) <=> (pred==1 & t==1) | (pred==0 & t==0).
    pred_pos = x >= 0.5
    correct = (pred_pos & (t == 1.0)) | ((~pred_pos) & (t == 0.0))
    correct = correct & mask
    c_f = correct.astype(jnp.float32)
    t_m = jnp.where(mask, t, 0.0)

    def fold(v):
        # (BR,128) -> (8,128) via elementwise VPU adds (tile-aligned reshape, no XLU).
        return v.reshape(br // _SUBLANES, _SUBLANES, _LANES).sum(axis=0)

    acc_ref[0, :, :] += fold(c_f)                   # count of correct predictions
    acc_ref[1, :, :] += fold(t_m * c_f)             # TP = sum(target on correct elems)
    acc_ref[2, :, :] += fold(t_m)                   # sum(target)


def loss_all(inputs_, targets, smooth=1):
    """JAX/Pallas equivalent of Loss_all.forward. Returns (precision, recall, FPR, FNR)."""
    del smooth  # accepted but unused, same as the PyTorch module
    inp = inputs_.reshape(-1)
    tgt = targets.reshape(-1)
    n = inp.shape[0]

    tile = _SUBLANES * _LANES
    n_pad = pl.cdiv(n, tile) * tile
    if n_pad != n:
        # Only taken when n is not already a multiple of 8*128 (pad values are
        # masked out inside the kernel, so their content is irrelevant).
        inp = jnp.pad(inp, (0, n_pad - n))
        tgt = jnp.pad(tgt, (0, n_pad - n))
    inp2 = inp.reshape(-1, _LANES)                  # free reshape of contiguous buffer
    tgt2 = tgt.reshape(-1, _LANES)
    n_rows = inp2.shape[0]                          # multiple of 8, >= 8

    block_rows = min(_MAX_BLOCK_ROWS, n_rows)       # multiple of 8
    grid = pl.cdiv(n_rows, block_rows)              # last block may be partial (masked)

    n_valid = jnp.array([n], dtype=jnp.int32)

    partials = pl.pallas_call(
        _metrics_kernel,
        out_shape=jax.ShapeDtypeStruct((3, _SUBLANES, _LANES), jnp.float32),
        grid_spec=pltpu.PrefetchScalarGridSpec(
            num_scalar_prefetch=1,
            grid=(grid,),
            in_specs=[
                pl.BlockSpec((block_rows, _LANES), lambda i, n_s: (i, 0)),
                pl.BlockSpec((block_rows, _LANES), lambda i, n_s: (i, 0)),
            ],
            out_specs=pl.BlockSpec((3, _SUBLANES, _LANES),
                                   lambda i, n_s: (0, 0, 0)),
        ),
        compiler_params=pltpu.CompilerParams(
            dimension_semantics=("arbitrary",)),
    )(n_valid, inp2, tgt2)

    sums = jnp.sum(partials, axis=(1, 2))           # tiny (3,8,128) reduction in XLA
    count_correct = sums[0]                         # len(T_)
    TP = sums[1]                                    # T_.sum()
    sum_t = sums[2]                                 # targets.sum()

    TN = count_correct - TP                         # len(T_) - T_.sum()
    FP = sum_t - TP                                 # F_.sum()
    FN = (jnp.float32(n) - count_correct) - FP      # len(F_) - F_.sum()

    precision = TP / (TP + FP)
    recall = TP / (TP + FN)
    FPR = FP / (FP + TN)
    FNR = FN / (FN + TP)
    return precision, recall, FPR, FNR


def _reference(inputs_, targets):
    """Pure-JAX reference reproducing the PyTorch code path."""
    inp = inputs_.reshape(-1).astype(jnp.float32)
    tgt = targets.reshape(-1).astype(jnp.float32)
    pred = jnp.where(inp >= 0.5, 1.0, 0.0)
    correct = (pred == tgt)
    TP = jnp.sum(jnp.where(correct, tgt, 0.0))
    TN = jnp.sum(correct.astype(jnp.float32)) - TP
    FP = jnp.sum(jnp.where(~correct, tgt, 0.0))
    FN = jnp.sum((~correct).astype(jnp.float32)) - FP
    return (TP / (TP + FP), TP / (TP + FN), FP / (FP + TN), FN / (FN + TP))


def _check(shape, key):
    k1, k2 = jax.random.split(key)
    inputs = jax.random.uniform(k1, shape, dtype=jnp.float32)
    targets = (jax.random.uniform(k2, shape) > 0.5).astype(jnp.float32)
    out = jax.block_until_ready(loss_all(inputs, targets))
    ref = jax.block_until_ready(_reference(inputs, targets))
    for a, b in zip(out, ref):
        assert jnp.allclose(a, b, atol=1e-5), (shape, a, b)


if __name__ == "__main__":
    key = jax.random.PRNGKey(0)
    k0, k1, k2 = jax.random.split(key, 3)

    # Primary case: segmentation-style NCHW [2, 4, 16, 16] (2048 elems, aligned).
    _check((2, 4, 16, 16), k0)
    # Ragged case: exercises the pad-to-tile + in-kernel masking path.
    _check((3, 5, 7, 11), k1)
    # Multi-block case with a partial last block (1040 rows, 1024-row blocks).
    _check((1, 2, 260, 256), k2)

    print("KERNEL_OK")
</pallas_src>

<mosaic_0001>
module attributes {stable_mosaic.version = 11 : i64} {
  func.func @_metrics_kernel(%arg0: i32, %arg1: memref<1xi32, #tpu.memory_space<smem>>, %arg2: memref<16x128xf32, #tpu.memory_space<vmem>>, %arg3: memref<16x128xf32, #tpu.memory_space<vmem>>, %arg4: memref<3x8x128xf32, #tpu.memory_space<vmem>>) attributes {dimension_semantics = [#tpu.dimension_semantics<arbitrary>], iteration_bounds = array<i64: 1>, scalar_prefetch = 1 : i64, scratch_operands = 0 : i64, tpu.core_type = #tpu.core_type<tc>, window_params = [{transform_indices = @transform_0, window_bounds = array<i64: 16, 128>}, {transform_indices = @transform_1, window_bounds = array<i64: 16, 128>}, {pipeline_mode = #tpu.pipeline_mode<synchronous>, transform_indices = @transform_2, window_bounds = array<i64: 3, 8, 128>}]} {
    %c0_i32 = arith.constant 0 : i32
    %0 = arith.cmpi eq, %arg0, %c0_i32 : i32
    %1 = arith.extui %0 : i1 to i32
    %c0_i32_0 = arith.constant 0 : i32
    %2 = arith.cmpi ne, %1, %c0_i32_0 : i32
    scf.if %2 {
      %cst_28 = arith.constant 0.000000e+00 : f32
      %55 = vector.broadcast %cst_28 : f32 to vector<3x8x128xf32>
      %c0_29 = arith.constant 0 : index
      %c0_30 = arith.constant 0 : index
      %c0_31 = arith.constant 0 : index
      %56 = vector.load %arg4[%c0_29, %c0_30, %c0_31] : memref<3x8x128xf32, #tpu.memory_space<vmem>>, vector<3x8x128xf32>
      tpu.vector_store %arg4[%c0_29, %c0_30, %c0_31], %55 {strides = array<i32>} : memref<3x8x128xf32, #tpu.memory_space<vmem>>, vector<3x8x128xf32>,
    } else {
    }
    %c0 = arith.constant 0 : index
    %c0_1 = arith.constant 0 : index
    %3 = vector.load %arg2[%c0, %c0_1] : memref<16x128xf32, #tpu.memory_space<vmem>>, vector<16x128xf32>
    %c0_2 = arith.constant 0 : index
    %c0_3 = arith.constant 0 : index
    %4 = vector.load %arg3[%c0_2, %c0_3] : memref<16x128xf32, #tpu.memory_space<vmem>>, vector<16x128xf32>
    %5 = tpu.iota {dimensions = array<i32: 0>} : vector<16x128xi32>
    %6 = tpu.iota {dimensions = array<i32: 1>} : vector<16x128xi32>
    %c0_4 = arith.constant 0 : index
    %7 = memref.load %arg1[%c0_4] : memref<1xi32, #tpu.memory_space<smem>>
    %c2048_i32 = arith.constant 2048 : i32
    %8 = arith.muli %arg0, %c2048_i32 : i32
    %9 = arith.subi %7, %8 : i32
    %c128_i32 = arith.constant 128 : i32
    %10 = vector.broadcast %c128_i32 : i32 to vector<16x128xi32>
    %11 = arith.muli %5, %10 : vector<16x128xi32>
    %12 = arith.addi %11, %6 : vector<16x128xi32>
    %13 = vector.broadcast %9 : i32 to vector<16x128xi32>
    %14 = arith.cmpi slt, %12, %13 : vector<16x128xi32>
    %cst = arith.constant 5.000000e-01 : f32
    %15 = vector.broadcast %cst : f32 to vector<16x128xf32>
    %16 = arith.cmpf oge, %3, %15 : vector<16x128xf32>
    %cst_5 = arith.constant 1.000000e+00 : f32
    %17 = vector.broadcast %cst_5 : f32 to vector<16x128xf32>
    %18 = arith.cmpf oeq, %4, %17 : vector<16x128xf32>
    %19 = arith.andi %16, %18 : vector<16x128xi1>
    %cst_6 = arith.constant dense<true> : vector<16x128xi1>
    %20 = arith.xori %16, %cst_6 : vector<16x128xi1>
    %cst_7 = arith.constant 0.000000e+00 : f32
    %21 = vector.broadcast %cst_7 : f32 to vector<16x128xf32>
    %22 = arith.cmpf oeq, %4, %21 : vector<16x128xf32>
    %23 = arith.andi %20, %22 : vector<16x128xi1>
    %24 = arith.ori %19, %23 : vector<16x128xi1>
    %25 = arith.andi %24, %14 : vector<16x128xi1>
    %26 = arith.extui %25 : vector<16x128xi1> to vector<16x128xi32>
    %27 = arith.sitofp %26 : vector<16x128xi32> to vector<16x128xf32>
    %cst_8 = arith.constant 0.000000e+00 : f32
    %28 = vector.broadcast %cst_8 : f32 to vector<16x128xf32>
    %29 = arith.select %14, %4, %28 : vector<16x128xi1>, vector<16x128xf32>
    %c0_9 = arith.constant 0 : index
    %c0_10 = arith.constant 0 : index
    %c0_11 = arith.constant 0 : index
    %30 = vector.load %arg4[%c0_9, %c0_10, %c0_11] : memref<3x8x128xf32, #tpu.memory_space<vmem>>, vector<1x8x128xf32>
    %31 = vector.shape_cast %30 : vector<1x8x128xf32> to vector<8x128xf32>
    %32 = vector.shape_cast %27 : vector<16x128xf32> to vector<2x8x128xf32>
    %cst_12 = arith.constant dense<0.000000e+00> : vector<8x128xf32>
    %33 = vector.multi_reduction <add>, %32, %cst_12 [0] : vector<2x8x128xf32> to vector<8x128xf32>
    %34 = arith.addf %31, %33 : vector<8x128xf32>
    %c0_13 = arith.constant 0 : index
    %c0_14 = arith.constant 0 : index
    %c0_15 = arith.constant 0 : index
    %35 = vector.load %arg4[%c0_13, %c0_14, %c0_15] : memref<3x8x128xf32, #tpu.memory_space<vmem>>, vector<1x8x128xf32>
    %36 = vector.shape_cast %35 : vector<1x8x128xf32> to vector<8x128xf32>
    %37 = vector.shape_cast %34 : vector<8x128xf32> to vector<1x8x128xf32>
    tpu.vector_store %arg4[%c0_13, %c0_14, %c0_15], %37 {strides = array<i32>} : memref<3x8x128xf32, #tpu.memory_space<vmem>>, vector<1x8x128xf32>,
    %c1 = arith.constant 1 : index
    %c0_16 = arith.constant 0 : index
    %c0_17 = arith.constant 0 : index
    %38 = vector.load %arg4[%c1, %c0_16, %c0_17] : memref<3x8x128xf32, #tpu.memory_space<vmem>>, vector<1x8x128xf32>
    %39 = vector.shape_cast %38 : vector<1x8x128xf32> to vector<8x128xf32>
    %40 = arith.mulf %29, %27 : vector<16x128xf32>
    %41 = vector.shape_cast %40 : vector<16x128xf32> to vector<2x8x128xf32>
    %cst_18 = arith.constant dense<0.000000e+00> : vector<8x128xf32>
    %42 = vector.multi_reduction <add>, %41, %cst_18 [0] : vector<2x8x128xf32> to vector<8x128xf32>
    %43 = arith.addf %39, %42 : vector<8x128xf32>
    %c1_19 = arith.constant 1 : index
    %c0_20 = arith.constant 0 : index
    %c0_21 = arith.constant 0 : index
    %44 = vector.load %arg4[%c1_19, %c0_20, %c0_21] : memref<3x8x128xf32, #tpu.memory_space<vmem>>, vector<1x8x128xf32>
    %45 = vector.shape_cast %44 : vector<1x8x128xf32> to vector<8x128xf32>
    %46 = vector.shape_cast %43 : vector<8x128xf32> to vector<1x8x128xf32>
    tpu.vector_store %arg4[%c1_19, %c0_20, %c0_21], %46 {strides = array<i32>} : memref<3x8x128xf32, #tpu.memory_space<vmem>>, vector<1x8x128xf32>,
    %c2 = arith.constant 2 : index
    %c0_22 = arith.constant 0 : index
    %c0_23 = arith.constant 0 : index
    %47 = vector.load %arg4[%c2, %c0_22, %c0_23] : memref<3x8x128xf32, #tpu.memory_space<vmem>>, vector<1x8x128xf32>
    %48 = vector.shape_cast %47 : vector<1x8x128xf32> to vector<8x128xf32>
    %49 = vector.shape_cast %29 : vector<16x128xf32> to vector<2x8x128xf32>
    %cst_24 = arith.constant dense<0.000000e+00> : vector<8x128xf32>
    %50 = vector.multi_reduction <add>, %49, %cst_24 [0] : vector<2x8x128xf32> to vector<8x128xf32>
    %51 = arith.addf %48, %50 : vector<8x128xf32>
    %c2_25 = arith.constant 2 : index
    %c0_26 = arith.constant 0 : index
    %c0_27 = arith.constant 0 : index
    %52 = vector.load %arg4[%c2_25, %c0_26, %c0_27] : memref<3x8x128xf32, #tpu.memory_space<vmem>>, vector<1x8x128xf32>
    %53 = vector.shape_cast %52 : vector<1x8x128xf32> to vector<8x128xf32>
    %54 = vector.shape_cast %51 : vector<8x128xf32> to vector<1x8x128xf32>
    tpu.vector_store %arg4[%c2_25, %c0_26, %c0_27], %54 {strides = array<i32>} : memref<3x8x128xf32, #tpu.memory_space<vmem>>, vector<1x8x128xf32>,
    return
  }
  func.func @transform_0(%arg0: i32, %arg1: memref<1xi32, #tpu.memory_space<smem>>) -> (i32, i32) {
    %c0_i32 = arith.constant 0 : i32
    %c0_i32_0 = arith.constant 0 : i32
    return %arg0, %c0_i32 : i32, i32
  }
  func.func @transform_1(%arg0: i32, %arg1: memref<1xi32, #tpu.memory_space<smem>>) -> (i32, i32) {
    %c0_i32 = arith.constant 0 : i32
    %c0_i32_0 = arith.constant 0 : i32
    return %arg0, %c0_i32 : i32, i32
  }
  func.func @transform_2(%arg0: i32, %arg1: memref<1xi32, #tpu.memory_space<smem>>) -> (i32, i32, i32) {
    %c0_i32 = arith.constant 0 : i32
    %c0_i32_0 = arith.constant 0 : i32
    %c0_i32_1 = arith.constant 0 : i32
    %c0_i32_2 = arith.constant 0 : i32
    return %c0_i32, %c0_i32_0, %c0_i32_1 : i32, i32, i32
  }
}

</mosaic_0001>

<bundles_post_ra>
// kernel: tpu_custom_call.1
= control target key start
LH: loop header
LB: loop body
LE: loop exit
PB: predicated region body
PF: predicated region fallthrough
CT: control target
= control target key end

     0   :  { %9 = vsyncpa [#allocation5], 0  ;;  %s296_s0 = inlined_call_operand.<no memory space> [shape: s32[1], index: 0, kind: input, shape index: {}]   ;;  %s297_s1 = inlined_call_operand.hbm [shape: f32[16,128], index: 1, kind: input, shape index: {}]   ;;  %s298_s2 = inlined_call_operand.hbm [shape: f32[16,128], index: 2, kind: input, shape index: {}]   ;;  %s299_s3 = inlined_call_operand.hbm [shape: f32[3,8,128], index: 3, kind: output, shape index: {}]  }
   0x1   :  { %10 = vsyncpa [#allocation8], 0 }
   0x2   :  { %11 = vsyncpa [#allocation6], 0  ;;  %s205_s12 = smov [#allocation4]   ;;  %s133_s16 = scalar_lea.hbm %s297_s1, 256 }
   0x3   :  { %s17_s13 = sshll.u32 %s205_s12, 4  ;;  %p134_p0 = scmp.ne.s32.totalorder %s297_s1, %s133_s16  ;;  %s18_s13 = int_to_ptr.vmem [resolvable:$true] %s17_s13 }
   0x4   :  { %p137_p1 = scmp.lt.u32.totalorder %s133_s16, %s297_s1 }
   0x6   :  { %p139_p2 = pnand %p137_p1, %p134_p0 }
   0x8   :  { %142 = shalt.err (!%p139_p2)
}
   0x9   :  { %s143_s21 = scalar_lea.vmem %s18_s13, 256  ;;  %p148_p4 = scmp.lt.s32.totalorder %s18_s13, %s18_s13 }
   0xa   :  { %p144_p3 = scmp.ne.s32.totalorder %s18_s13, %s143_s21  ;;  %p149_p5 = scmp.lt.s32.totalorder %s143_s21, %s143_s21 }
   0xc   :  { %p150_p6 = por %p149_p5, %p148_p4 }
   0xe   :  { %p151_p7 = pnand %p150_p6, %p144_p3 }
  0x10   :  { %154 = shalt.err (!%p151_p7)
}
  0x11   :  { %s206_s22 = smov 128   ;;  %s207_s23 = smov 8  }
  0x12   :  { %23 = dma.hbm_to_vmem [thread:$0]  %s297_s1, 256, %s18_s13, [#allocation5], %s206_s22, %s206_s22, %s207_s23  }
  0x13   :  { %s208_s26 = smov [#allocation7]   ;;  %s155_s30 = scalar_lea.hbm %s298_s2, 256 }
  0x14   :  { %s29_s27 = sshll.u32 %s208_s26, 4  ;;  %p156_p8 = scmp.ne.s32.totalorder %s298_s2, %s155_s30  ;;  %s30_s27 = int_to_ptr.vmem [resolvable:$true] %s29_s27 }
  0x15   :  { %p159_p9 = scmp.lt.u32.totalorder %s155_s30, %s298_s2 }
  0x17   :  { %p161_p10 = pnand %p159_p9, %p156_p8 }
  0x19   :  { %164 = shalt.err (!%p161_p10)
}
  0x1a   :  { %s165_s8 = scalar_lea.vmem %s30_s27, 256  ;;  %p170_p12 = scmp.lt.s32.totalorder %s30_s27, %s30_s27 }
  0x1b   :  { %p166_p11 = scmp.ne.s32.totalorder %s30_s27, %s165_s8  ;;  %p171_p13 = scmp.lt.s32.totalorder %s165_s8, %s165_s8 }
  0x1d   :  { %p172_p0 = por %p171_p13, %p170_p12 }
  0x1f   :  { %p173_p1 = pnand %p172_p0, %p166_p11 }
  0x21   :  { %176 = shalt.err (!%p173_p1)
}
  0x22   :  { %35 = dma.hbm_to_vmem [thread:$0]  %s298_s2, 256, %s30_s27, [#allocation8], %s206_s22, %s206_s22, %s207_s23  }
  0x23   :  { %199 = dma.done.wait [#allocation5], 256  }
  0x24   :  { %200 = vsyncadd [#allocation5], 4294967040 }
  0x25   :  { %201 = dma.done.wait [#allocation8], 256  }
  0x26   :  { %202 = vsyncadd [#allocation8], 4294967040  ;;  %v53_v0 = vlaneseq  ;;  %v65_v5 = vstv %s296_s0  ;;  %v49_v8 = vld [vmem:[#allocation4] sm:$0xff]  ;;  %v50_v9 = vld [vmem:[#allocation4 + $0x8] sm:$0xff]  ;;  %vm209_vm5 = vmmov 1   ;;  %v210_v18 = vmov 0.0  }
  0x27   :  { %v51_v10 = vld [vmem:[#allocation7] sm:$0xff]  ;;  %v52_v11 = vld [vmem:[#allocation7 + $0x8] sm:$0xff]  ;;  %vm68_vm1 = vcmp.ge.f32.partialorder %v49_v8, 0.5  ;;  %vm69_vm2 = vcmp.ge.f32.partialorder %v50_v9, 0.5  ;;  %s211_s0 = smov [#allocation9]  }
  0x28   :  { %v54_v1 = vshrl.u32 %v53_v0, 7  ;;  %v57_v2 = vand.u32 127, %v53_v0  ;;  %vm70_vm3 = vcmp.eq.f32.partialorder %v51_v10, 1.0  ;;  %vm71_vm4 = vcmp.eq.f32.partialorder %v52_v11, 1.0  ;;  %vm74_vm6 = vmxor %vm68_vm1, %vm209_vm5  ;;  %s111_s2 = sshll.u32 %s211_s0, 4  ;;  %s112_s2 = int_to_ptr.vmem [resolvable:$true] %s111_s2 }
  0x29   :  { %vm72_vm8 = vmand %vm68_vm1, %vm70_vm3  ;;  %vm76_vm9 = vcmp.eq.f32.partialorder %v51_v10, 0.0  ;;  %vm77_vm11 = vcmp.eq.f32.partialorder %v52_v11, 0.0  ;;  %s177_s12 = scalar_lea.vmem %s112_s2, 384  ;;  %p182_p3 = scmp.lt.s32.totalorder %s112_s2, %s112_s2 }
  0x2a   :  { %v55_v3 = vadd.s32 8, %v54_v1  ;;  %v61_v4 = vmul.u32 128, %v54_v1  ;;  %vm73_vm10 = vmand %vm69_vm2, %vm71_vm4  ;;  %p178_p2 = scmp.ne.s32.totalorder %s112_s2, %s177_s12  ;;  %p183_p4 = scmp.lt.s32.totalorder %s177_s12, %s177_s12 }
  0x2b   :  { %vm75_vm12 = vmxor %vm69_vm2, %vm209_vm5 }
  0x2c   :  { %v62_v6 = vmul.u32 128, %v55_v3  ;;  %v63_v7 = vadd.s32 %v61_v4, %v57_v2  ;;  %vm78_vm13 = vmand %vm74_vm6, %vm76_vm9  ;;  %p184_p5 = por %p183_p4, %p182_p3 }
  0x2d   :  { %vm79_vm14 = vmand %vm75_vm12, %vm77_vm11 }
  0x2e   :  { %v64_v12 = vadd.s32 %v62_v6, %v57_v2  ;;  %vm265_vm0 = vcmp.lt.s32.totalorder %v63_v7, %v65_v5  ;;  %vm80_vm15 = vmor %vm72_vm8, %vm78_vm13  ;;  %p185_p6 = pnand %p184_p5, %p178_p2 }
  0x2f   :  { %v88_v15 = vsel %vm265_vm0, %v51_v10, 0.0  ;;  %vm81_vm1 = vmor %vm73_vm10, %vm79_vm14 }
  0x30   :  { %vm269_vm7 = vcmp.lt.s32.totalorder %v64_v12, %v65_v5  ;;  %vm82_vm3 = vmand %vm80_vm15, %vm265_vm0 }
  0x31   :  { %v89_v16 = vsel %vm269_vm7, %v52_v11, 0.0  ;;  %vm83_vm4 = vmand %vm81_vm1, %vm269_vm7  ;;  %v124_v19 = vsel %vm82_vm3, 1.0, %v210_v18 }
  0x32   :  { %v103_v17 = vadd.f32 %v89_v16, %v88_v15  ;;  %v125_v20 = vsel %vm83_vm4, 1.0, %v210_v18  ;;  %v96_v21 = vmul.f32 %v124_v19, %v88_v15 }
  0x33   :  { %v91_v22 = vadd.f32 %v125_v20, %v124_v19  ;;  %v97_v23 = vmul.f32 %v125_v20, %v89_v16 }
  0x34   :  { %105 = vst [vmem:[#allocation9 + $0x10] sm:$0xff] %v103_v17 }
  0x35   :  { %v98_v24 = vadd.f32 %v97_v23, %v96_v21  ;;  %93 = vst [vmem:[#allocation9] sm:$0xff] %v91_v22 }
  0x37   :  { %100 = vst [vmem:[#allocation9 + $0x8] sm:$0xff] %v98_v24 }
  0x38   :  { %188 = shalt.err (!%p185_p6)
}
  0x39   :  { %s189_s15 = scalar_lea.hbm %s299_s3, 384 }
  0x3a   :  { %p190_p7 = scmp.ne.s32.totalorder %s299_s3, %s189_s15  ;;  %p193_p8 = scmp.lt.u32.totalorder %s189_s15, %s299_s3 }
  0x3c   :  { %p195_p9 = pnand %p193_p8, %p190_p7 }
  0x3e   :  { %198 = shalt.err (!%p195_p9)
}
  0x3f   :  { %117 = dma.vmem_to_hbm [thread:$0]  %s112_s2, 384, %s299_s3, [#allocation6], %s206_s22, %s206_s22, %s207_s23  }
  0x40   :  { %203 = dma.done.wait [#allocation6], 384  }
  0x41   :  { %204 = vsyncadd [#allocation6], 4294966912 }
  0x42   :  { %121 = vsyncpa [#allocation5], 1 }
  0x43   :  { %122 = vsyncpa [#allocation8], 1 }
  0x44   :  { %123 = vsyncpa [#allocation6], 1 }

</bundles_post_ra>
